<compile_context>
chip_gen: v5e
topology: v5e:2x2
jax: 0.10.0
libtpu: 0.0.40
codegen_flags: <defaults>
</compile_context>

<pallas_src>
import jax
import jax.numpy as jnp
from jax.experimental import pallas as pl
from jax.experimental.pallas import tpu as pltpu


def make_weaved_pe(attn_size: int, sample: int,
                   pe_type: str = "sine", master_axis: bool = True) -> jnp.ndarray:
    """Deterministic construction of the PE buffer (matches the PyTorch __init__)."""
    assert pe_type == "sine", "only 'sine' implemented"
    position = jnp.arange(sample, dtype=jnp.float32)[:, None]            # (S, 1)
    div_term = jnp.exp(
        jnp.arange(0, attn_size, 4, dtype=jnp.float32)
        * (-9.210340371976184 / attn_size)
    )                                                                     # (D/4,)
    pe = jnp.zeros((sample, attn_size), dtype=jnp.float32)
    if master_axis:
        # torch.kron(div_term, ones(2)) == repeat each element twice
        div_term = jnp.repeat(div_term, 2)                                # (D/2,)
        arg = position * div_term                                         # (S, D/2)
        pe = pe.at[:, 0::2].set(jnp.sin(arg))
        pe = pe.at[:, 1::2].set(jnp.cos(arg))
    else:
        arg = position * div_term                                         # (S, D/4)
        pe = pe.at[:, 0::4].set(jnp.sin(arg))
        pe = pe.at[:, 1::4].set(jnp.sin(arg))
        pe = pe.at[:, 2::4].set(jnp.cos(arg))
        pe = pe.at[:, 3::4].set(jnp.cos(arg))
    return pe                                                             # (S, D)


# ~4 MiB per block: 2x-buffered x-in + 2x out + 2x pe  <=  ~24 MiB
# (under the 32 MiB default scoped VMEM on v6e/v7x, and well under v5e/v6e physical).
_MAX_BLOCK_BYTES = 4 * 1024 * 1024


def _pick_lane_tile(sd: int, itemsize: int) -> int:
    """Largest lane tile that is a multiple of 128, divides sd, and fits the budget.

    Falls back to the full dimension when sd is not 128-aligned (full-extent blocks
    are always legal and avoid masked partial tiles).
    """
    if sd % 128 != 0 or sd * itemsize <= _MAX_BLOCK_BYTES:
        return sd
    max_elems = max(128, _MAX_BLOCK_BYTES // itemsize)
    base = sd // 128
    best = 128
    d = 1
    while d * d <= base:
        if base % d == 0:
            for q in (d, base // d):
                c = q * 128
                if best < c <= max_elems:
                    best = c
        d += 1
    return best


def _pick_batch_tile(batch: int, lane_tile: int, itemsize: int) -> int:
    """Batch rows per block: full batch if it fits, else the largest 8-aligned divisor."""
    if batch * lane_tile * itemsize <= _MAX_BLOCK_BYTES or batch % 8 != 0:
        return batch
    bb = 8
    for cand in range(8, batch, 8):
        if batch % cand == 0 and cand * lane_tile * itemsize <= _MAX_BLOCK_BYTES:
            bb = cand
    return bb


def _pe_add_kernel(x_ref, pe_ref, o_ref):
    # x_ref: (Bb, C), pe_ref: (1, C) broadcast over the sublane (batch-row) axis.
    o_ref[...] = (x_ref[...] + pe_ref[...]).astype(o_ref.dtype)


def weaved_positional_encoding(x: jnp.ndarray, pe: jnp.ndarray) -> jnp.ndarray:
    """x: (B, S, D), pe: (S, D) -> x + pe (broadcast over batch)."""
    B, S, D = x.shape
    assert pe.shape == (S, D)

    out_dtype = jnp.result_type(x.dtype, pe.dtype)   # torch promotion semantics
    itemsize = jnp.dtype(out_dtype).itemsize

    SD = S * D
    x2 = x.reshape(B, SD)                            # lane-dense slab
    pe2 = pe.reshape(1, SD).astype(out_dtype)        # cast once on the host

    C = _pick_lane_tile(SD, itemsize)                # lane tile (multiple of 128 or full)
    Bb = _pick_batch_tile(B, C, itemsize)            # sublane tile (8-aligned or full)
    num_c = SD // C
    num_b = B // Bb

    x_bytes = B * SD * jnp.dtype(x.dtype).itemsize
    pe_bytes = SD * itemsize
    out_bytes = B * SD * itemsize

    out2 = pl.pallas_call(
        _pe_add_kernel,
        out_shape=jax.ShapeDtypeStruct((B, SD), out_dtype),
        grid_spec=pltpu.PrefetchScalarGridSpec(
            num_scalar_prefetch=0,
            # batch innermost -> pe block index constant across the inner loop,
            # so pe stays resident in VMEM and is DMA'd only num_c times total.
            grid=(num_c, num_b),
            in_specs=[
                pl.BlockSpec((Bb, C), lambda c, b: (b, c)),
                pl.BlockSpec((1, C), lambda c, b: (0, c)),
            ],
            out_specs=pl.BlockSpec((Bb, C), lambda c, b: (b, c)),
        ),
        compiler_params=pltpu.CompilerParams(
            dimension_semantics=("parallel", "parallel"),
        ),
        cost_estimate=pl.CostEstimate(
            flops=B * SD,
            transcendentals=0,
            bytes_accessed=x_bytes + pe_bytes + out_bytes,
        ),
    )(x2, pe2)

    return out2.reshape(B, S, D)


if __name__ == "__main__":
    # Small shapes consistent with the module: batch=2, seq(sample)=16, attn_size=32.
    B, S, D = 2, 16, 32

    key = jax.random.PRNGKey(0)
    x = jax.random.normal(key, (B, S, D), dtype=jnp.float32)

    pe = make_weaved_pe(attn_size=D, sample=S, pe_type="sine", master_axis=True)

    out = weaved_positional_encoding(x, pe)
    out = jax.block_until_ready(out)

    # Reference check (plain JAX broadcast add, same semantics as x + self.pe).
    ref = x + pe[None, :, :]
    assert out.shape == (B, S, D)
    assert jnp.allclose(out, ref, atol=1e-6, rtol=1e-6)

    print("KERNEL_OK")
</pallas_src>

<mosaic_0001>
module attributes {stable_mosaic.version = 11 : i64} {
  func.func @_pe_add_kernel(%arg0: i32, %arg1: i32, %arg2: memref<2x512xf32, #tpu.memory_space<vmem>>, %arg3: memref<1x512xf32, #tpu.memory_space<vmem>>, %arg4: memref<2x512xf32, #tpu.memory_space<vmem>>) attributes {dimension_semantics = [#tpu.dimension_semantics<parallel>, #tpu.dimension_semantics<parallel>], iteration_bounds = array<i64: 1, 1>, scalar_prefetch = 0 : i64, scratch_operands = 0 : i64, tpu.core_type = #tpu.core_type<tc>, window_params = [{transform_indices = @transform_0, window_bounds = array<i64: 2, 512>}, {transform_indices = @transform_1, window_bounds = array<i64: 1, 512>}, {transform_indices = @transform_2, window_bounds = array<i64: 2, 512>}]} {
    %c0 = arith.constant 0 : index
    %c0_0 = arith.constant 0 : index
    %0 = vector.load %arg2[%c0, %c0_0] : memref<2x512xf32, #tpu.memory_space<vmem>>, vector<2x512xf32>
    %c0_1 = arith.constant 0 : index
    %c0_2 = arith.constant 0 : index
    %1 = vector.load %arg3[%c0_1, %c0_2] : memref<1x512xf32, #tpu.memory_space<vmem>>, vector<1x512xf32>
    %2 = vector.broadcast %1 : vector<1x512xf32> to vector<2x512xf32>
    %3 = arith.addf %0, %2 : vector<2x512xf32>
    %c0_3 = arith.constant 0 : index
    %c0_4 = arith.constant 0 : index
    %4 = vector.load %arg4[%c0_3, %c0_4] : memref<2x512xf32, #tpu.memory_space<vmem>>, vector<2x512xf32>
    tpu.vector_store %arg4[%c0_3, %c0_4], %3 {strides = array<i32>} : memref<2x512xf32, #tpu.memory_space<vmem>>, vector<2x512xf32>,
    return
  }
  func.func @transform_0(%arg0: i32, %arg1: i32) -> (i32, i32) {
    %c0_i32 = arith.constant 0 : i32
    return %arg1, %arg0 : i32, i32
  }
  func.func @transform_1(%arg0: i32, %arg1: i32) -> (i32, i32) {
    %c0_i32 = arith.constant 0 : i32
    %c0_i32_0 = arith.constant 0 : i32
    return %c0_i32, %arg0 : i32, i32
  }
  func.func @transform_2(%arg0: i32, %arg1: i32) -> (i32, i32) {
    %c0_i32 = arith.constant 0 : i32
    return %arg1, %arg0 : i32, i32
  }
}

</mosaic_0001>

<bundles_post_ra>
// kernel: tpu_custom_call.1
= control target key start
LH: loop header
LB: loop body
LE: loop exit
PB: predicated region body
PF: predicated region fallthrough
CT: control target
= control target key end

     0   :  { %7 = vsyncpa [#allocation3], 0  ;;  %s185_s0 = inlined_call_operand.hbm [shape: f32[2,512], index: 0, kind: input, shape index: {}]   ;;  %s186_s1 = inlined_call_operand.hbm [shape: f32[1,512], index: 1, kind: input, shape index: {}]   ;;  %s187_s2 = inlined_call_operand.hbm [shape: f32[2,512], index: 2, kind: output, shape index: {}]  }
   0x1   :  { %8 = vsyncpa [#allocation6], 0 }
   0x2   :  { %9 = vsyncpa [#allocation4], 0  ;;  %s15_s11 = sshll.u32 %s185_s0, 4  ;;  %s158_s12 = smov [#allocation2]   ;;  %s16_s11 = int_to_ptr.hbm [resolvable:$true] %s15_s11 }
   0x3   :  { %s17_s13 = sshll.u32 %s158_s12, 4  ;;  %s26_s16 = sshll.u32 %s186_s1, 4  ;;  %s18_s13 = int_to_ptr.vmem [resolvable:$true] %s17_s13  ;;  %s27_s16 = int_to_ptr.hbm [resolvable:$true] %s26_s16 }
   0x4   :  { %20 = dma.hbm_to_vmem [thread:$0]  %s16_s11, 128, %s18_s13, [#allocation3]  }
   0x5   :  { %s159_s17 = smov [#allocation5]  }
   0x6   :  { %s28_s18 = sshll.u32 %s159_s17, 4  ;;  %s29_s18 = int_to_ptr.vmem [resolvable:$true] %s28_s18 }
   0x7   :  { %31 = dma.hbm_to_vmem [thread:$0]  %s27_s16, 64, %s29_s18, [#allocation6]  }
   0x8   :  { %152 = dma.done.wait [#allocation3], 128  }
   0x9   :  { %153 = vsyncadd [#allocation3], 4294967168 }
   0xa   :  { %154 = dma.done.wait [#allocation6], 64  }
   0xb   :  { %155 = vsyncadd [#allocation6], 4294967232  ;;  %v41_v0 = vld [vmem:[#allocation5] sm:$0xf]  ;;  %vm50_vm0 = vcmask 1041408   ;;  %vm52_vm1 = vcmask 1045508  }
   0xc   :  { %v43_v1 = vperm.slane %v41_v0, 0  ;;  %v44_v2 = vperm.slane %v41_v0, 1  ;;  %v45_v3 = vperm.slane %v41_v0, 2  ;;  %v46_v4 = vperm.slane %v41_v0, 3  ;;  %v40_v8 = vld [vmem:[#allocation2] sm:$0xff]  ;;  %s160_s0 = smov [#allocation7]  }
   0xd   :  { %vm54_vm2 = vcmask 1043456   ;;  %s64_s1 = sshll.u32 %s160_s0, 4  ;;  %s66_s21 = sshll.u32 %s187_s2, 4  ;;  %s65_s1 = int_to_ptr.vmem [resolvable:$true] %s64_s1  ;;  %s67_s21 = int_to_ptr.hbm [resolvable:$true] %s66_s21 }
   0xe   :  { %v47_v5 = vrot.slane %v44_v2, 6  ;;  %v48_v6 = vrot.slane %v45_v3, 4  ;;  %v49_v7 = vrot.slane %v46_v4, 2 }
  0x10   :  { %v51_v9 = vsel %vm50_vm0, %v43_v1, %v47_v5  ;;  %v53_v10 = vsel %vm52_vm1, %v48_v6, %v49_v7 }
  0x11   :  { %v55_v11 = vsel %vm54_vm2, %v51_v9, %v53_v10 }
  0x12   :  { %v57_v12 = vadd.f32 %v55_v11, %v40_v8 }
  0x14   :  { %58 = vst [vmem:[#allocation7] sm:$0xff] %v57_v12 }
  0x15   :  { %69 = dma.vmem_to_hbm [thread:$0]  %s65_s1, 128, %s67_s21, [#allocation4]  }
  0x16   :  { %156 = dma.done.wait [#allocation4], 128  }
  0x17   :  { %157 = vsyncadd [#allocation4], 4294967168 }
  0x18   :  { %74 = vsyncpa [#allocation3], 1 }
  0x19   :  { %75 = vsyncpa [#allocation6], 1 }
  0x1a   :  { %76 = vsyncpa [#allocation4], 1 }

</bundles_post_ra>
